<compile_context>
chip_gen: v6e
topology: v6e:2x2x1
jax: 0.10.0
libtpu: 0.0.40
codegen_flags: <defaults>
</compile_context>

<pallas_src>
import functools

import jax
import jax.numpy as jnp
from jax import lax
from jax.experimental import pallas as pl
from jax.experimental.pallas import tpu as pltpu


def _masked_linear_kernel(x_ref, w_ref, m_ref, b_ref, o_ref, acc_ref, *,
                          compute_dtype):
    k = pl.program_id(2)

    @pl.when(k == 0)
    def _():
        acc_ref[...] = jnp.zeros_like(acc_ref)

    # Clamp mask to [0, 1] and apply it to the weight tile (VPU elementwise).
    mask_clamped = jnp.clip(m_ref[...], 0.0, 1.0)
    masked_w = w_ref[...] * mask_clamped                     # (tn, tk)

    x = x_ref[...]                                           # (tm, tk)
    if compute_dtype != x.dtype:
        x = x.astype(compute_dtype)
        masked_w = masked_w.astype(compute_dtype)

    # x @ masked_w.T without materializing a transpose: contract dim 1 of x
    # with dim 1 of masked_w directly on the MXU, f32 accumulation.
    acc_ref[...] += lax.dot_general(
        x, masked_w,
        dimension_numbers=(((1,), (1,)), ((), ())),
        preferred_element_type=jnp.float32)                  # (tm, tn)

    @pl.when(k == pl.num_programs(2) - 1)
    def _():
        o_ref[...] = (acc_ref[...] + b_ref[...]).astype(o_ref.dtype)


def _round_up(a, b):
    return ((a + b - 1) // b) * b


def masked_linear(x, weight, mask, bias=None, *,
                  tm=None, tn=256, tk=512, compute_dtype=jnp.float32):
    """x: (B, in), weight/mask: (out, in), bias: (out,) or None -> (B, out)."""
    B, K = x.shape
    N, Kw = weight.shape
    assert Kw == K and mask.shape == weight.shape

    if bias is None:
        bias = jnp.zeros((N,), dtype=x.dtype)

    # Tile sizes: lane dim multiples of 128, sublane multiples of 8; clamp to
    # the (padded) problem size so small layers use a single tile per axis.
    tn = min(tn, _round_up(N, 128))
    tk = min(tk, _round_up(K, 128))
    if tm is None:
        # Small batches: keep the whole batch in one M tile so the (tn, tk)
        # weight/mask tile is never re-streamed per batch tile.
        tm = min(_round_up(B, 8), 128)

    B_pad = _round_up(B, tm)
    K_pad = _round_up(K, tk)
    N_pad = _round_up(N, tn)

    x_p = x if (B_pad == B and K_pad == K) else jnp.pad(
        x, ((0, B_pad - B), (0, K_pad - K)))
    w_p = weight if (N_pad == N and K_pad == K) else jnp.pad(
        weight, ((0, N_pad - N), (0, K_pad - K)))
    m_p = mask if (N_pad == N and K_pad == K) else jnp.pad(
        mask, ((0, N_pad - N), (0, K_pad - K)))
    b_p = jnp.pad(bias, (0, N_pad - N)).reshape(1, N_pad)

    grid = (B_pad // tm, N_pad // tn, K_pad // tk)

    kernel = functools.partial(_masked_linear_kernel,
                               compute_dtype=compute_dtype)

    out = pl.pallas_call(
        kernel,
        out_shape=jax.ShapeDtypeStruct((B_pad, N_pad), x.dtype),
        grid_spec=pltpu.PrefetchScalarGridSpec(
            num_scalar_prefetch=0,
            grid=grid,
            in_specs=[
                pl.BlockSpec((tm, tk), lambda i, j, k: (i, k)),   # x
                pl.BlockSpec((tn, tk), lambda i, j, k: (j, k)),   # weight
                pl.BlockSpec((tn, tk), lambda i, j, k: (j, k)),   # mask
                pl.BlockSpec((1, tn), lambda i, j, k: (0, j)),    # bias
            ],
            out_specs=pl.BlockSpec((tm, tn), lambda i, j, k: (i, j)),
            scratch_shapes=[pltpu.VMEM((tm, tn), jnp.float32)],
        ),
        compiler_params=pltpu.CompilerParams(
            dimension_semantics=("parallel", "parallel", "arbitrary")),
    )(x_p, w_p, m_p, b_p)

    return out[:B, :N]


def init_params(key, in_features, out_features):
    """Deterministic init mirroring the module's __init__ shapes.

    kaiming_uniform_(a=sqrt(5)) on a (out, in) weight reduces to
    U(-1/sqrt(in), 1/sqrt(in)); bias is U(-1/sqrt(fan_in), 1/sqrt(fan_in));
    mask starts at ones.
    """
    kw, kb = jax.random.split(key)
    bound = 1.0 / jnp.sqrt(jnp.float32(in_features))
    weight = jax.random.uniform(
        kw, (out_features, in_features), jnp.float32, -bound, bound)
    bias = jax.random.uniform(
        kb, (out_features,), jnp.float32, -bound, bound)
    mask = jnp.ones((out_features, in_features), jnp.float32)
    return weight, mask, bias


if __name__ == "__main__":
    key = jax.random.PRNGKey(0)
    k_x, k_p, k_m = jax.random.split(key, 3)

    batch, in_features, out_features = 8, 32, 16
    x = jax.random.normal(k_x, (batch, in_features), jnp.float32)
    weight, mask, bias = init_params(k_p, in_features, out_features)
    # Perturb the mask so the clamp actually does something (values outside [0,1]).
    mask = mask + 0.75 * jax.random.normal(k_m, mask.shape, jnp.float32)

    # Pure-JAX reference of the exact PyTorch semantics.
    ref = x @ (weight * jnp.clip(mask, 0.0, 1.0)).T + bias

    # f32 MXU path (tight tolerance).
    out = masked_linear(x, weight, mask, bias)
    out = jax.block_until_ready(out)
    assert out.shape == (batch, out_features)
    assert jnp.allclose(out, ref, atol=1e-5, rtol=1e-5)

    # bf16 MXU inputs with f32 accumulation (looser tolerance).
    out_bf16 = masked_linear(x, weight, mask, bias,
                             compute_dtype=jnp.bfloat16)
    out_bf16 = jax.block_until_ready(out_bf16)
    assert jnp.allclose(out_bf16, ref, atol=5e-2, rtol=5e-2)

    print("KERNEL_OK")
</pallas_src>

<mosaic_0001>
module attributes {stable_mosaic.version = 11 : i64} {
  func.func @_masked_linear_kernel(%arg0: i32, %arg1: i32, %arg2: i32, %arg3: memref<8x128xf32, #tpu.memory_space<vmem>>, %arg4: memref<128x128xf32, #tpu.memory_space<vmem>>, %arg5: memref<128x128xf32, #tpu.memory_space<vmem>>, %arg6: memref<1x128xf32, #tpu.memory_space<vmem>>, %arg7: memref<8x128xf32, #tpu.memory_space<vmem>>, %arg8: memref<8x128xf32, #tpu.memory_space<vmem>>) attributes {dimension_semantics = [#tpu.dimension_semantics<parallel>, #tpu.dimension_semantics<parallel>, #tpu.dimension_semantics<arbitrary>], iteration_bounds = array<i64: 1, 1, 1>, scalar_prefetch = 0 : i64, scratch_operands = 1 : i64, tpu.core_type = #tpu.core_type<tc>, window_params = [{transform_indices = @transform_0, window_bounds = array<i64: 8, 128>}, {transform_indices = @transform_1, window_bounds = array<i64: 128, 128>}, {transform_indices = @transform_2, window_bounds = array<i64: 128, 128>}, {transform_indices = @transform_3, window_bounds = array<i64: 1, 128>}, {transform_indices = @transform_4, window_bounds = array<i64: 8, 128>}]} {
    %c0_i32 = arith.constant 0 : i32
    %0 = arith.cmpi eq, %arg2, %c0_i32 : i32
    %1 = arith.extui %0 : i1 to i32
    %c0_i32_0 = arith.constant 0 : i32
    %2 = arith.cmpi ne, %1, %c0_i32_0 : i32
    scf.if %2 {
      %cst_14 = arith.constant 0.000000e+00 : f32
      %18 = vector.broadcast %cst_14 : f32 to vector<8x128xf32>
      %c0_15 = arith.constant 0 : index
      %c0_16 = arith.constant 0 : index
      %19 = vector.load %arg8[%c0_15, %c0_16] : memref<8x128xf32, #tpu.memory_space<vmem>>, vector<8x128xf32>
      tpu.vector_store %arg8[%c0_15, %c0_16], %18 {strides = array<i32>} : memref<8x128xf32, #tpu.memory_space<vmem>>, vector<8x128xf32>,
    } else {
    }
    %c0 = arith.constant 0 : index
    %c0_1 = arith.constant 0 : index
    %3 = vector.load %arg5[%c0, %c0_1] : memref<128x128xf32, #tpu.memory_space<vmem>>, vector<128x128xf32>
    %cst = arith.constant 0.000000e+00 : f32
    %cst_2 = arith.constant 1.000000e+00 : f32
    %4 = vector.broadcast %cst : f32 to vector<128x128xf32>
    %5 = arith.maximumf %4, %3 : vector<128x128xf32>
    %6 = vector.broadcast %cst_2 : f32 to vector<128x128xf32>
    %7 = arith.minimumf %6, %5 : vector<128x128xf32>
    %c0_3 = arith.constant 0 : index
    %c0_4 = arith.constant 0 : index
    %8 = vector.load %arg4[%c0_3, %c0_4] : memref<128x128xf32, #tpu.memory_space<vmem>>, vector<128x128xf32>
    %9 = arith.mulf %8, %7 : vector<128x128xf32>
    %c0_5 = arith.constant 0 : index
    %c0_6 = arith.constant 0 : index
    %10 = vector.load %arg3[%c0_5, %c0_6] : memref<8x128xf32, #tpu.memory_space<vmem>>, vector<8x128xf32>
    %c0_7 = arith.constant 0 : index
    %c0_8 = arith.constant 0 : index
    %11 = vector.load %arg8[%c0_7, %c0_8] : memref<8x128xf32, #tpu.memory_space<vmem>>, vector<8x128xf32>
    %cst_9 = arith.constant dense<0.000000e+00> : vector<8x128xf32>
    %12 = tpu.matmul %10, %9, %cst_9 {dimension_numbers = #tpu.dot_dimension_numbers<[1], [1], [0], [0], [0, 0, 1, 0], [], []>} : vector<8x128xf32>, vector<128x128xf32>, vector<8x128xf32> -> vector<8x128xf32>
    %13 = arith.addf %11, %12 : vector<8x128xf32>
    %c0_10 = arith.constant 0 : index
    %c0_11 = arith.constant 0 : index
    %14 = vector.load %arg8[%c0_10, %c0_11] : memref<8x128xf32, #tpu.memory_space<vmem>>, vector<8x128xf32>
    tpu.vector_store %arg8[%c0_10, %c0_11], %13 {strides = array<i32>} : memref<8x128xf32, #tpu.memory_space<vmem>>, vector<8x128xf32>,
    %c0_i32_12 = arith.constant 0 : i32
    %15 = arith.cmpi eq, %arg2, %c0_i32_12 : i32
    %16 = arith.extui %15 : i1 to i32
    %c0_i32_13 = arith.constant 0 : i32
    %17 = arith.cmpi ne, %16, %c0_i32_13 : i32
    scf.if %17 {
      %c0_14 = arith.constant 0 : index
      %c0_15 = arith.constant 0 : index
      %18 = vector.load %arg8[%c0_14, %c0_15] : memref<8x128xf32, #tpu.memory_space<vmem>>, vector<8x128xf32>
      %c0_16 = arith.constant 0 : index
      %c0_17 = arith.constant 0 : index
      %19 = vector.load %arg6[%c0_16, %c0_17] : memref<1x128xf32, #tpu.memory_space<vmem>>, vector<1x128xf32>
      %20 = vector.broadcast %19 : vector<1x128xf32> to vector<8x128xf32>
      %21 = arith.addf %18, %20 : vector<8x128xf32>
      %c0_18 = arith.constant 0 : index
      %c0_19 = arith.constant 0 : index
      %22 = vector.load %arg7[%c0_18, %c0_19] : memref<8x128xf32, #tpu.memory_space<vmem>>, vector<8x128xf32>
      tpu.vector_store %arg7[%c0_18, %c0_19], %21 {strides = array<i32>} : memref<8x128xf32, #tpu.memory_space<vmem>>, vector<8x128xf32>,
    } else {
    }
    return
  }
  func.func @transform_0(%arg0: i32, %arg1: i32, %arg2: i32) -> (i32, i32) {
    %c0_i32 = arith.constant 0 : i32
    return %arg0, %arg2 : i32, i32
  }
  func.func @transform_1(%arg0: i32, %arg1: i32, %arg2: i32) -> (i32, i32) {
    %c0_i32 = arith.constant 0 : i32
    return %arg1, %arg2 : i32, i32
  }
  func.func @transform_2(%arg0: i32, %arg1: i32, %arg2: i32) -> (i32, i32) {
    %c0_i32 = arith.constant 0 : i32
    return %arg1, %arg2 : i32, i32
  }
  func.func @transform_3(%arg0: i32, %arg1: i32, %arg2: i32) -> (i32, i32) {
    %c0_i32 = arith.constant 0 : i32
    %c0_i32_0 = arith.constant 0 : i32
    return %c0_i32, %arg1 : i32, i32
  }
  func.func @transform_4(%arg0: i32, %arg1: i32, %arg2: i32) -> (i32, i32) {
    %c0_i32 = arith.constant 0 : i32
    return %arg0, %arg1 : i32, i32
  }
}

</mosaic_0001>

<bundles_post_ra>
// kernel: tpu_custom_call.1
= control target key start
LH: loop header
LB: loop body
LE: loop exit
PB: predicated region body
PF: predicated region fallthrough
CT: control target
= control target key end

     0   :  { %9 = vsyncpa [#allocation4], 0  ;;  %s457_s0 = inlined_call_operand.hbm [shape: f32[8,128], index: 0, kind: input, shape index: {}]   ;;  %s458_s1 = inlined_call_operand.hbm [shape: f32[128,128], index: 1, kind: input, shape index: {}]   ;;  %s459_s2 = inlined_call_operand.hbm [shape: f32[128,128], index: 2, kind: input, shape index: {}]   ;;  %s460_s3 = inlined_call_operand.vmem [shape: f32[1,128], index: 3, kind: input, shape index: {}]   ;;  %s461_s4 = inlined_call_operand.hbm [shape: f32[8,128], index: 4, kind: output, shape index: {}]  }
   0x1   :  { %10 = vsyncpa [#allocation7], 0 }
   0x2   :  { %11 = vsyncpa [#allocation5], 0  ;;  %s392_s15 = smov [#allocation6]  }
   0x3   :  { %s27_s16 = sshll.u32 %s392_s15, 4  ;;  %s28_s16 = int_to_ptr.vmem [resolvable:$true] %s27_s16 }
   0x4   :  { %s314_s17 = scalar_lea.vmem %s28_s16, 2048  ;;  %p319_p1 = scmp.lt.s32.totalorder %s28_s16, %s28_s16 }
   0x5   :  { %p315_p0 = scmp.ne.s32.totalorder %s28_s16, %s314_s17  ;;  %p320_p2 = scmp.lt.s32.totalorder %s314_s17, %s314_s17 }
   0x7   :  { %p321_p3 = por %p320_p2, %p319_p1 }
   0x9   :  { %p322_p4 = pnand %p321_p3, %p315_p0 }
   0xb   :  { %325 = shalt.err (!%p322_p4)
}
   0xc   :  { %s393_s18 = smov 128   ;;  %s394_s19 = smov 8  }
   0xd   :  { %33 = dma.hbm_to_vmem [thread:$0]  %s458_s1, 2048, %s28_s16, [#allocation7], %s393_s18, %s393_s18, %s394_s19  }
   0xe   :  { %s395_s22 = smov [#allocation3]   ;;  %s396_s24 = smov [#allocation8]  }
   0xf   :  { %s18_s23 = sshll.u32 %s395_s22, 4  ;;  %s39_s25 = sshll.u32 %s396_s24, 4  ;;  %s19_s23 = int_to_ptr.vmem [resolvable:$true] %s18_s23  ;;  %s40_s25 = int_to_ptr.vmem [resolvable:$true] %s39_s25 }
  0x10   :  { %s334_s26 = scalar_lea.vmem %s19_s23, 128  ;;  %p339_p6 = scmp.lt.s32.totalorder %s19_s23, %s19_s23 }
  0x11   :  { %p335_p5 = scmp.ne.s32.totalorder %s19_s23, %s334_s26  ;;  %p340_p7 = scmp.lt.s32.totalorder %s334_s26, %s334_s26 }
  0x13   :  { %p341_p8 = por %p340_p7, %p339_p6 }
  0x15   :  { %p342_p9 = pnand %p341_p8, %p335_p5 }
  0x17   :  { %345 = shalt.err (!%p342_p9)
}
  0x18   :  { %21 = dma.hbm_to_vmem [thread:$0]  %s457_s0, 128, %s19_s23, [#allocation4]  }
  0x19   :  { %s354_s29 = scalar_lea.vmem %s40_s25, 2048  ;;  %p359_p11 = scmp.lt.s32.totalorder %s40_s25, %s40_s25 }
  0x1a   :  { %p355_p10 = scmp.ne.s32.totalorder %s40_s25, %s354_s29  ;;  %p360_p12 = scmp.lt.s32.totalorder %s354_s29, %s354_s29 }
  0x1c   :  { %p361_p13 = por %p360_p12, %p359_p11 }
  0x1e   :  { %p362_p0 = pnand %p361_p13, %p355_p10 }
  0x20   :  { %365 = shalt.err (!%p362_p0)
}
  0x21   :  { %45 = dma.hbm_to_vmem [thread:$0]  %s459_s2, 2048, %s40_s25, [#allocation7], %s393_s18, %s393_s18, %s394_s19  }
  0x22   :  { %386 = dma.done.wait [#allocation4], 128  }
  0x23   :  { %387 = vsyncadd [#allocation4], 4294967168 }
  0x24   :  { %388 = dma.done.wait [#allocation7], 4096  }
  0x25   :  { %389 = vsyncadd [#allocation7], 4294963200  ;;  %v397_v0 = vmov 0.0   ;;  %vm398_vm0 = vmmov 0   ;;  %v77_v1 = vld [vmem:[#allocation8 + $0x78] sm:$0xff]  ;;  %v76_v2 = vld [vmem:[#allocation8 + $0x70] sm:$0xff] }
  0x26   :  { %263 = vmatprep.subr.mxu0 %v397_v0  ;;  %295 = vmatprep.mubr.msk.f32.mxu0 %vm398_vm0, %v397_v0  ;;  %v93_v3 = vmax.f32 %v77_v1, 0.0  ;;  %v92_v4 = vmax.f32 %v76_v2, 0.0  ;;  %v75_v5 = vld [vmem:[#allocation8 + $0x68] sm:$0xff]  ;;  %v125_v6 = vld [vmem:[#allocation6 + $0x78] sm:$0xff]  ;;  %v124_v10 = vld [vmem:[#allocation6 + $0x70] sm:$0xff]  ;;  %s399_s5 = smov [#allocation9]  }
  0x27   :  { %v91_v9 = vmax.f32 %v75_v5, 0.0  ;;  %v74_v11 = vld [vmem:[#allocation8 + $0x60] sm:$0xff]  ;;  %v123_v16 = vld [vmem:[#allocation6 + $0x68] sm:$0xff]  ;;  %v73_v17 = vld [vmem:[#allocation8 + $0x58] sm:$0xff]  ;;  %s235_s6 = sshll.u32 %s399_s5, 4  ;;  %s236_s6 = int_to_ptr.vmem [resolvable:$true] %s235_s6 }
  0x28   :  { %v109_v7 = vmin.f32 %v93_v3, 1.0  ;;  %v108_v8 = vmin.f32 %v92_v4, 1.0  ;;  %v90_v15 = vmax.f32 %v74_v11, 0.0  ;;  %v89_v20 = vmax.f32 %v73_v17, 0.0  ;;  %v122_v21 = vld [vmem:[#allocation6 + $0x60] sm:$0xff]  ;;  %v72_v22 = vld [vmem:[#allocation8 + $0x50] sm:$0xff]  ;;  %p371_p2 = scmp.lt.s32.totalorder %s236_s6, %s236_s6 }
  0x29   :  { %v107_v14 = vmin.f32 %v91_v9, 1.0  ;;  %v88_v25 = vmax.f32 %v72_v22, 0.0  ;;  %v121_v26 = vld [vmem:[#allocation6 + $0x58] sm:$0xff]  ;;  %v71_v27 = vld [vmem:[#allocation8 + $0x48] sm:$0xff]  ;;  %v120_v31 = vld [vmem:[#allocation6 + $0x50] sm:$0xff]  ;;  %s366_s7 = scalar_lea.vmem %s236_s6, 128 }
  0x2a   :  { %v141_v12 = vmul.f32 %v125_v6, %v109_v7  ;;  %v140_v13 = vmul.f32 %v124_v10, %v108_v8  ;;  %v106_v19 = vmin.f32 %v90_v15, 1.0  ;;  %v105_v24 = vmin.f32 %v89_v20, 1.0  ;;  %v70_v32 = vld [vmem:[#allocation8 + $0x40] sm:$0xff]  ;;  %v119_v36 = vld [vmem:[#allocation6 + $0x48] sm:$0xff]  ;;  %v69_v37 = vld [vmem:[#allocation8 + $0x38] sm:$0xff]  ;;  %p367_p1 = scmp.ne.s32.totalorder %s236_s6, %s366_s7  ;;  %p372_p3 = scmp.lt.s32.totalorder %s366_s7, %s366_s7 }
  0x2b   :  { %v139_v18 = vmul.f32 %v123_v16, %v107_v14  ;;  %v104_v29 = vmin.f32 %v88_v25, 1.0  ;;  %v87_v30 = vmax.f32 %v71_v27, 0.0  ;;  %v86_v35 = vmax.f32 %v70_v32, 0.0  ;;  %v118_v41 = vld [vmem:[#allocation6 + $0x40] sm:$0xff]  ;;  %v68_v42 = vld [vmem:[#allocation8 + $0x30] sm:$0xff]  ;;  %v117_v46 = vld [vmem:[#allocation6 + $0x38] sm:$0xff] }
  0x2c   :  { %264 = vmatpush3.xpose.msra.mxu0 %v141_v12  ;;  %v138_v23 = vmul.f32 %v122_v21, %v106_v19  ;;  %v137_v28 = vmul.f32 %v121_v26, %v105_v24  ;;  %v85_v40 = vmax.f32 %v69_v37, 0.0  ;;  %v84_v45 = vmax.f32 %v68_v42, 0.0  ;;  %v67_v47 = vld [vmem:[#allocation8 + $0x28] sm:$0xff]  ;;  %v116_v51 = vld [vmem:[#allocation6 + $0x30] sm:$0xff]  ;;  %v66_v52 = vld [vmem:[#allocation8 + $0x20] sm:$0xff]  ;;  %p373_p4 = por %p372_p3, %p371_p2 }
  0x2d   :  { %265 = vmatprep.subr.mxu0 %v397_v0  ;;  %v136_v33 = vmul.f32 %v120_v31, %v104_v29  ;;  %v103_v34 = vmin.f32 %v87_v30, 1.0  ;;  %v102_v39 = vmin.f32 %v86_v35, 1.0  ;;  %v83_v50 = vmax.f32 %v67_v47, 0.0  ;;  %v115_v56 = vld [vmem:[#allocation6 + $0x28] sm:$0xff]  ;;  %v65_v57 = vld [vmem:[#allocation8 + $0x18] sm:$0xff]  ;;  %v114_v61 = vld [vmem:[#allocation6 + $0x20] sm:$0xff] }
  0x2e   :  { %v101_v44 = vmin.f32 %v85_v40, 1.0  ;;  %v100_v49 = vmin.f32 %v84_v45, 1.0  ;;  %v82_v55 = vmax.f32 %v66_v52, 0.0  ;;  %v81_v60 = vmax.f32 %v65_v57, 0.0  ;;  %v64_v62 = vld [vmem:[#allocation8 + $0x10] sm:$0xff]  ;;  %v113_v3 = vld [vmem:[#allocation6 + $0x18] sm:$0xff]  ;;  %p374_p5 = pnand %p373_p4, %p367_p1 }
  0x2f   :  { %v135_v38 = vmul.f32 %v119_v36, %v103_v34  ;;  %v134_v43 = vmul.f32 %v118_v41, %v102_v39  ;;  %v99_v54 = vmin.f32 %v83_v50, 1.0  ;;  %v80_v2 = vmax.f32 %v64_v62, 0.0  ;;  %v63_v4 = vld [vmem:[#allocation8 + $0x8] sm:$0xff]  ;;  %v112_v8 = vld [vmem:[#allocation6 + $0x10] sm:$0xff]  ;;  %v62_v9 = vld [vmem:[#allocation8] sm:$0xff] }
  0x30   :  { %266 = vmatpush3.xpose.msra.mxu0 %v140_v13  ;;  %v133_v48 = vmul.f32 %v117_v46, %v101_v44  ;;  %v132_v53 = vmul.f32 %v116_v51, %v100_v49  ;;  %v98_v59 = vmin.f32 %v82_v55, 1.0  ;;  %v97_v1 = vmin.f32 %v81_v60, 1.0  ;;  %v111_v13 = vld [vmem:[#allocation6 + $0x8] sm:$0xff]  ;;  %v110_v16 = vld [vmem:[#allocation6] sm:$0xff]  ;;  %v245_v19 = vld [vmem:[%s460_s3] ss:$0 sm:$0xff] }
  0x31   :  { %267 = vmatprep.subr.mxu0 %v397_v0  ;;  %v131_v58 = vmul.f32 %v115_v56, %v99_v54  ;;  %v96_v6 = vmin.f32 %v80_v2, 1.0  ;;  %v79_v7 = vmax.f32 %v63_v4, 0.0  ;;  %v78_v12 = vmax.f32 %v62_v9, 0.0 }
  0x32   :  { %v130_v63 = vmul.f32 %v114_v61, %v98_v59  ;;  %v129_v5 = vmul.f32 %v113_v3, %v97_v1 }
  0x33   :  { %v128_v10 = vmul.f32 %v112_v8, %v96_v6  ;;  %v95_v11 = vmin.f32 %v79_v7, 1.0  ;;  %v94_v15 = vmin.f32 %v78_v12, 1.0 }
  0x34   :  { %268 = vmatpush3.xpose.msra.mxu0 %v139_v18  ;;  %v142_v18 = vld [vmem:[#allocation3] sm:$0xff] }
  0x35   :  { %269 = vmatprep.subr.mxu0 %v397_v0  ;;  %v127_v14 = vmul.f32 %v111_v13, %v95_v11  ;;  %v126_v17 = vmul.f32 %v110_v16, %v94_v15 }
  0x38   :  { %270 = vmatpush3.xpose.msra.mxu0 %v138_v23 }
  0x39   :  { %271 = vmatprep.subr.mxu0 %v397_v0 }
  0x3c   :  { %272 = vmatpush3.xpose.msra.mxu0 %v137_v28 }
  0x3d   :  { %273 = vmatprep.subr.mxu0 %v397_v0 }
  0x40   :  { %274 = vmatpush3.xpose.msra.mxu0 %v136_v33 }
  0x41   :  { %275 = vmatprep.subr.mxu0 %v397_v0 }
  0x44   :  { %276 = vmatpush3.xpose.msra.mxu0 %v135_v38 }
  0x45   :  { %277 = vmatprep.subr.mxu0 %v397_v0 }
  0x48   :  { %278 = vmatpush3.xpose.msra.mxu0 %v134_v43 }
  0x49   :  { %279 = vmatprep.subr.mxu0 %v397_v0 }
  0x4c   :  { %280 = vmatpush3.xpose.msra.mxu0 %v133_v48 }
  0x4d   :  { %281 = vmatprep.subr.mxu0 %v397_v0 }
  0x50   :  { %282 = vmatpush3.xpose.msra.mxu0 %v132_v53 }
  0x51   :  { %283 = vmatprep.subr.mxu0 %v397_v0 }
  0x54   :  { %284 = vmatpush3.xpose.msra.mxu0 %v131_v58 }
  0x55   :  { %285 = vmatprep.subr.mxu0 %v397_v0 }
  0x58   :  { %286 = vmatpush3.xpose.msra.mxu0 %v130_v63 }
  0x59   :  { %287 = vmatprep.subr.mxu0 %v397_v0 }
  0x5c   :  { %288 = vmatpush3.xpose.msra.mxu0 %v129_v5 }
  0x5d   :  { %289 = vmatprep.subr.mxu0 %v397_v0 }
  0x60   :  { %290 = vmatpush3.xpose.msra.mxu0 %v128_v10 }
  0x61   :  { %291 = vmatprep.subr.mxu0 %v397_v0 }
  0x64   :  { %292 = vmatpush3.xpose.msra.mxu0 %v127_v14 }
  0x65   :  { %293 = vmatprep.subr.mxu0 %v397_v0 }
  0x68   :  { %294 = vmatpush3.xpose.msra.mxu0 %v126_v17 }
  0x6b   :  { %296 = vmatmul.mubr.f32.vlgmr.msra.gmra.mxu0 %v142_v18 }
 0x12b   :  { %v210_v20 = vpop.f32.mrf.mxu0 }
 0x12c   :  { %v227_v21 = vadd.f32 %v245_v19, %v210_v20 }
 0x12d   :  { %v297_v22 = vpop.f32.mrf.mxu0 }
 0x12e   :  { %228 = vst [vmem:[#allocation9] sm:$0xff] %v227_v21 }
 0x12f   :  { %377 = shalt.err (!%p374_p5)
}
 0x130   :  { %238 = dma.vmem_to_hbm [thread:$0]  %s236_s6, 128, %s461_s4, [#allocation5]  }
 0x131   :  { %390 = dma.done.wait [#allocation5], 128  }
 0x132   :  { %391 = vsyncadd [#allocation5], 4294967168 }
 0x133   :  { %242 = vsyncpa [#allocation4], 1 }
 0x134   :  { %243 = vsyncpa [#allocation7], 1 }
 0x135   :  { %244 = vsyncpa [#allocation5], 1 }

</bundles_post_ra>
